<compile_context>
chip_gen: v7x
topology: tpu7x:2x2x1
jax: 0.10.0
libtpu: 0.0.40
codegen_flags: <defaults>
</compile_context>

<pallas_src>
import functools

import jax
import jax.numpy as jnp
from jax import lax
from jax.experimental import pallas as pl
from jax.experimental.pallas import tpu as pltpu

BN_EPS = 1e-5


def skspp_kernel(x_ref, patches_ref, w1_ref, vecs_ref, wfc_ref, wd_ref, out_ref,
                 *, n, hw, c, d):
    """Whole SKSPP forward on small channel-major tensors resident in VMEM.

    x_ref:       (C, M)   f32   branch-0 features (raw input), pixels on lanes
    patches_ref: (9C, M)  bf16  im2col patches of the dilated 3x3 conv (tap-major rows)
    w1_ref:      (C, 9C)  bf16  conv weight (tap-major columns, matches patch rows)
    vecs_ref:    (P, 4)   f32   packed [gamma | beta | bfc | ba1-ba0] column vectors
    wfc_ref:     (d, C)   f32   squeeze FC weight
    wd_ref:      (C, d)   f32   branch-difference attention weight (wa1 - wa0)
    out_ref:     (C, M)   f32
    """
    # ---- branch 1: dilated 3x3 conv as ONE bf16 im2col matmul on the MXU (K = 9C) ----
    conv = jnp.dot(w1_ref[...], patches_ref[...],
                   preferred_element_type=jnp.float32)                     # (C, M) f32

    # ---- BatchNorm2d, train-mode batch stats over all pixels (= lane axis), f32 ----
    # conv bias omitted: it is exactly cancelled by the mean subtraction below.
    mean = jnp.mean(conv, axis=1, keepdims=True)                           # (C, 1)
    var = jnp.mean(conv * conv, axis=1, keepdims=True) - mean * mean
    gamma = vecs_ref[:c, 0:1]
    beta = vecs_ref[:c, 1:2]
    scale = gamma * lax.rsqrt(var + BN_EPS)
    shift = beta - mean * scale
    b1 = jnp.maximum(conv * scale + shift, 0.0)                            # BN -> ReLU

    # stash b1 in out_ref: frees its vregs across the squeeze/attention chain,
    # reloaded per-sample in the fuse loop below.
    out_ref[...] = b1

    # ---- per-sample global average pool of fea_U = b0 + b1 via lane-segment sums ----
    inv_hw = 1.0 / float(hw)
    lane = lax.broadcasted_iota(jnp.int32, (c, n), 1)
    fea_s = jnp.zeros((c, n), jnp.float32)
    for i in range(n):
        lo = i * hw
        seg_sum = jnp.sum(x_ref[:, lo:lo + hw] + b1[:, lo:lo + hw],
                          axis=1, keepdims=True) * inv_hw                  # (C, 1)
        fea_s = jnp.where(lane == i, seg_sum, fea_s)                       # (C, N)

    # ---- squeeze FC + fused branch-difference attention FC ----
    bfc = vecs_ref[:d, 2:3]
    bd = vecs_ref[:c, 3:4]
    fea_z = jnp.dot(wfc_ref[...], fea_s,
                    preferred_element_type=jnp.float32) + bfc              # (d, N)
    diff = jnp.dot(wd_ref[...], fea_z,
                   preferred_element_type=jnp.float32) + bd                # (C, N) = a1 - a0

    # softmax over the two branches: att1 = sigmoid(a1 - a0), att0 = 1 - att1
    att1 = 1.0 / (1.0 + jnp.exp(-diff))                                    # (C, N)

    # ---- weighted fuse: out = b0 + att1*(b1 - b0); HW is a multiple of 128 so each
    # store is a dense, unmasked vst ----
    for i in range(n):
        lo, hi = i * hw, (i + 1) * hw
        b0_seg = x_ref[:, lo:hi]
        b1_seg = out_ref[:, lo:hi]
        out_ref[:, lo:hi] = b0_seg + att1[:, i:i + 1] * (b1_seg - b0_seg)


@jax.jit
def skspp_forward(x_nchw, wconv, bconv, gamma, beta, wfc, bfc, wa, ba):
    """PyTorch-layout entry point: x (N,C,H,W) f32, wconv OIHW (C,C,3,3).

    `bconv` is accepted for interface parity but is mathematically a no-op:
    train-mode BN mean subtraction cancels any per-channel conv bias exactly.
    """
    del bconv
    N, C, H, W = x_nchw.shape
    d = wfc.shape[0]
    HW = H * W
    M = N * HW
    K9C = 9 * C

    # --- wrapper glue: channel-major layout, built without any lane-axis transpose ---
    x_c = jnp.transpose(x_nchw, (1, 0, 2, 3))                 # (C, N, H, W)
    x_t = x_c.reshape(C, M)                                   # (C, M)  pixels on lanes

    # im2col for kernel_size=3, dilation=3, padding=3 (SAME), tap-major row ordering.
    xp = jnp.pad(x_c, ((0, 0), (0, 0), (3, 3), (3, 3)))
    taps = [xp[:, :, 3 * ky:3 * ky + H, 3 * kx:3 * kx + W].reshape(C, M)
            for ky in range(3) for kx in range(3)]
    patches = jnp.concatenate(taps, axis=0).astype(jnp.bfloat16)           # (9C, M)

    # OIHW -> (Cout, tap*Cin + cin), matching the patch row ordering.
    w1_t = jnp.transpose(wconv, (0, 2, 3, 1)).reshape(C, K9C).astype(jnp.bfloat16)

    # branch-difference attention parameters (softmax over 2 branches uses only a1-a0).
    wd = wa[1] - wa[0]                                        # (C, d)
    bd = ba[1] - ba[0]                                        # (C,)

    # pack the small per-channel vectors into one lane-padded VMEM buffer.
    P = max(C, d)
    vecs = jnp.zeros((P, 4), jnp.float32)
    vecs = vecs.at[:C, 0].set(gamma).at[:C, 1].set(beta)
    vecs = vecs.at[:d, 2].set(bfc).at[:C, 3].set(bd)

    kernel = functools.partial(skspp_kernel, n=N, hw=HW, c=C, d=d)
    vmem = pl.BlockSpec(memory_space=pltpu.MemorySpace.VMEM)

    out_cm = pl.pallas_call(
        kernel,
        out_shape=jax.ShapeDtypeStruct((C, M), jnp.float32),
        in_specs=[vmem] * 6,
        out_specs=vmem,
        compiler_params=pltpu.CompilerParams(vmem_limit_bytes=32 * 1024 * 1024),
    )(x_t, patches, w1_t, vecs, wfc, wd)

    # (C, M) -> (N, C, H, W) with a single leading-axis swap.
    return jnp.transpose(out_cm.reshape(C, N, H, W), (1, 0, 2, 3))


def reference_forward(x_nchw, wconv, bconv, gamma, beta, wfc, bfc, wa, ba):
    """Pure-JAX f32 reference mirroring the PyTorch SKSPP module (M=2, train-mode BN)."""
    dn = ("NCHW", "OIHW", "NCHW")
    h = lax.conv_general_dilated(x_nchw, wconv, (1, 1), ((3, 3), (3, 3)),
                                 rhs_dilation=(3, 3), dimension_numbers=dn)
    h = h + bconv[None, :, None, None]
    mean = h.mean(axis=(0, 2, 3))
    var = ((h - mean[None, :, None, None]) ** 2).mean(axis=(0, 2, 3))
    h = (gamma[None, :, None, None] * (h - mean[None, :, None, None])
         * lax.rsqrt(var + BN_EPS)[None, :, None, None] + beta[None, :, None, None])
    h = jnp.maximum(h, 0.0)

    fea_u = x_nchw + h                                        # sum over the 2 branches
    fea_s = fea_u.mean(axis=(2, 3))                           # (N, C)
    fea_z = fea_s @ wfc.T + bfc                               # (N, d)
    logits = jnp.stack([fea_z @ wa[0].T + ba[0],
                        fea_z @ wa[1].T + ba[1]], axis=1)     # (N, 2, C)
    att = jax.nn.softmax(logits, axis=1)[..., None, None]     # (N, 2, C, 1, 1)
    feas = jnp.stack([x_nchw, h], axis=1)                     # (N, 2, C, H, W)
    return (feas * att).sum(axis=1)


if __name__ == "__main__":
    # SKSPP(features=32, WH=16) defaults: M=2, G=1, r=16, stride=1, L=32 -> d=32.
    features, WH = 32, 16
    d = max(int(features / 16), 32)
    N, H, W = 2, WH, WH

    key = jax.random.PRNGKey(0)
    ks = jax.random.split(key, 9)
    x = jax.random.normal(ks[0], (N, features, H, W), jnp.float32)

    wconv = jax.random.normal(ks[1], (features, features, 3, 3), jnp.float32) * 0.1
    bconv = jax.random.normal(ks[2], (features,), jnp.float32) * 0.1
    gamma = 1.0 + 0.1 * jax.random.normal(ks[3], (features,), jnp.float32)
    beta = 0.1 * jax.random.normal(ks[4], (features,), jnp.float32)
    wfc = jax.random.normal(ks[5], (d, features), jnp.float32) * 0.1
    bfc = jax.random.normal(ks[6], (d,), jnp.float32) * 0.1
    wa = jax.random.normal(ks[7], (2, features, d), jnp.float32) * 0.1
    ba = jax.random.normal(ks[8], (2, features), jnp.float32) * 0.1

    out = skspp_forward(x, wconv, bconv, gamma, beta, wfc, bfc, wa, ba)
    out = jax.block_until_ready(out)

    ref = reference_forward(x, wconv, bconv, gamma, beta, wfc, bfc, wa, ba)
    assert out.shape == (N, features, H, W)
    max_err = float(jnp.max(jnp.abs(out - ref)))
    # tolerance relaxed vs full-f32 reference: conv-matmul operands are bf16 (K = 288,
    # f32 accumulation); observed error stays well under this bound.
    assert jnp.allclose(out, ref, atol=2e-2, rtol=2e-2), max_err

    print("KERNEL_OK")
</pallas_src>

<mosaic_0001>
module attributes {stable_mosaic.version = 11 : i64} {
  func.func @skspp_kernel(%arg0: memref<32x512xf32, #tpu.memory_space<vmem>>, %arg1: memref<288x512xbf16, #tpu.memory_space<vmem>>, %arg2: memref<32x288xbf16, #tpu.memory_space<vmem>>, %arg3: memref<32x4xf32, #tpu.memory_space<vmem>>, %arg4: memref<32x32xf32, #tpu.memory_space<vmem>>, %arg5: memref<32x32xf32, #tpu.memory_space<vmem>>, %arg6: memref<32x512xf32, #tpu.memory_space<vmem>>) attributes {dimension_semantics = [], scalar_prefetch = 0 : i64, scratch_operands = 0 : i64, tpu.core_type = #tpu.core_type<tc>} {
    %c0 = arith.constant 0 : index
    %c0_0 = arith.constant 0 : index
    %0 = vector.load %arg2[%c0, %c0_0] : memref<32x288xbf16, #tpu.memory_space<vmem>>, vector<32x288xbf16>
    %c0_1 = arith.constant 0 : index
    %c0_2 = arith.constant 0 : index
    %1 = vector.load %arg1[%c0_1, %c0_2] : memref<288x512xbf16, #tpu.memory_space<vmem>>, vector<288x512xbf16>
    %cst = arith.constant dense<0.000000e+00> : vector<32x512xf32>
    %2 = tpu.matmul %0, %1, %cst {dimension_numbers = #tpu.dot_dimension_numbers<[1], [0], [0], [1], [0, 0, 1, 1], [], []>} : vector<32x288xbf16>, vector<288x512xbf16>, vector<32x512xf32> -> vector<32x512xf32>
    %cst_3 = arith.constant dense<0.000000e+00> : vector<32xf32>
    %3 = vector.multi_reduction <add>, %2, %cst_3 [1] : vector<32x512xf32> to vector<32xf32>
    %4 = vector.shape_cast %3 : vector<32xf32> to vector<32x1xf32>
    %cst_4 = arith.constant 5.120000e+02 : f32
    %5 = vector.broadcast %cst_4 : f32 to vector<32x1xf32>
    %6 = arith.divf %4, %5 : vector<32x1xf32>
    %7 = arith.mulf %2, %2 : vector<32x512xf32>
    %cst_5 = arith.constant dense<0.000000e+00> : vector<32xf32>
    %8 = vector.multi_reduction <add>, %7, %cst_5 [1] : vector<32x512xf32> to vector<32xf32>
    %9 = vector.shape_cast %8 : vector<32xf32> to vector<32x1xf32>
    %cst_6 = arith.constant 5.120000e+02 : f32
    %10 = vector.broadcast %cst_6 : f32 to vector<32x1xf32>
    %11 = arith.divf %9, %10 : vector<32x1xf32>
    %12 = arith.mulf %6, %6 : vector<32x1xf32>
    %13 = arith.subf %11, %12 : vector<32x1xf32>
    %c0_7 = arith.constant 0 : index
    %c0_8 = arith.constant 0 : index
    %14 = vector.load %arg3[%c0_7, %c0_8] : memref<32x4xf32, #tpu.memory_space<vmem>>, vector<32x1xf32>
    %c0_9 = arith.constant 0 : index
    %c1 = arith.constant 1 : index
    %15 = vector.load %arg3[%c0_9, %c1] : memref<32x4xf32, #tpu.memory_space<vmem>>, vector<32x1xf32>
    %cst_10 = arith.constant 9.99999974E-6 : f32
    %16 = vector.broadcast %cst_10 : f32 to vector<32x1xf32>
    %17 = arith.addf %13, %16 : vector<32x1xf32>
    %18 = math.rsqrt %17 : vector<32x1xf32>
    %19 = arith.mulf %14, %18 : vector<32x1xf32>
    %20 = arith.mulf %6, %19 : vector<32x1xf32>
    %21 = arith.subf %15, %20 : vector<32x1xf32>
    %22 = vector.broadcast %19 : vector<32x1xf32> to vector<32x512xf32>
    %23 = arith.mulf %2, %22 : vector<32x512xf32>
    %24 = vector.broadcast %21 : vector<32x1xf32> to vector<32x512xf32>
    %25 = arith.addf %23, %24 : vector<32x512xf32>
    %cst_11 = arith.constant 0.000000e+00 : f32
    %26 = vector.broadcast %cst_11 : f32 to vector<32x512xf32>
    %27 = arith.maximumf %25, %26 : vector<32x512xf32>
    %c0_12 = arith.constant 0 : index
    %c0_13 = arith.constant 0 : index
    %28 = vector.load %arg6[%c0_12, %c0_13] : memref<32x512xf32, #tpu.memory_space<vmem>>, vector<32x512xf32>
    tpu.vector_store %arg6[%c0_12, %c0_13], %27 {strides = array<i32>} : memref<32x512xf32, #tpu.memory_space<vmem>>, vector<32x512xf32>,
    %29 = tpu.iota {dimensions = array<i32: 1>} : vector<32x2xi32>
    %cst_14 = arith.constant 0.000000e+00 : f32
    %30 = vector.broadcast %cst_14 : f32 to vector<32x2xf32>
    %c0_15 = arith.constant 0 : index
    %c0_16 = arith.constant 0 : index
    %31 = vector.load %arg0[%c0_15, %c0_16] : memref<32x512xf32, #tpu.memory_space<vmem>>, vector<32x256xf32>
    %32 = vector.extract_strided_slice %27 {offsets = [0, 0], sizes = [32, 256], strides = [1, 1]} : vector<32x512xf32> to vector<32x256xf32>
    %33 = arith.addf %31, %32 : vector<32x256xf32>
    %cst_17 = arith.constant dense<0.000000e+00> : vector<32xf32>
    %34 = vector.multi_reduction <add>, %33, %cst_17 [1] : vector<32x256xf32> to vector<32xf32>
    %35 = vector.shape_cast %34 : vector<32xf32> to vector<32x1xf32>
    %cst_18 = arith.constant 3.906250e-03 : f32
    %36 = vector.broadcast %cst_18 : f32 to vector<32x1xf32>
    %37 = arith.mulf %35, %36 : vector<32x1xf32>
    %c0_i32 = arith.constant 0 : i32
    %38 = vector.broadcast %c0_i32 : i32 to vector<32x2xi32>
    %39 = arith.cmpi eq, %29, %38 : vector<32x2xi32>
    %40 = vector.shape_cast %37 : vector<32x1xf32> to vector<32x1xf32>
    %41 = vector.broadcast %40 : vector<32x1xf32> to vector<32x2xf32>
    %42 = arith.select %39, %41, %30 : vector<32x2xi1>, vector<32x2xf32>
    %c0_19 = arith.constant 0 : index
    %c256 = arith.constant 256 : index
    %43 = vector.load %arg0[%c0_19, %c256] : memref<32x512xf32, #tpu.memory_space<vmem>>, vector<32x256xf32>
    %44 = vector.extract_strided_slice %27 {offsets = [0, 256], sizes = [32, 256], strides = [1, 1]} : vector<32x512xf32> to vector<32x256xf32>
    %45 = arith.addf %43, %44 : vector<32x256xf32>
    %cst_20 = arith.constant dense<0.000000e+00> : vector<32xf32>
    %46 = vector.multi_reduction <add>, %45, %cst_20 [1] : vector<32x256xf32> to vector<32xf32>
    %47 = vector.shape_cast %46 : vector<32xf32> to vector<32x1xf32>
    %cst_21 = arith.constant 3.906250e-03 : f32
    %48 = vector.broadcast %cst_21 : f32 to vector<32x1xf32>
    %49 = arith.mulf %47, %48 : vector<32x1xf32>
    %c1_i32 = arith.constant 1 : i32
    %50 = vector.broadcast %c1_i32 : i32 to vector<32x2xi32>
    %51 = arith.cmpi eq, %29, %50 : vector<32x2xi32>
    %52 = vector.shape_cast %49 : vector<32x1xf32> to vector<32x1xf32>
    %53 = vector.broadcast %52 : vector<32x1xf32> to vector<32x2xf32>
    %54 = arith.select %51, %53, %42 : vector<32x2xi1>, vector<32x2xf32>
    %c0_22 = arith.constant 0 : index
    %c2 = arith.constant 2 : index
    %55 = vector.load %arg3[%c0_22, %c2] : memref<32x4xf32, #tpu.memory_space<vmem>>, vector<32x1xf32>
    %c0_23 = arith.constant 0 : index
    %c3 = arith.constant 3 : index
    %56 = vector.load %arg3[%c0_23, %c3] : memref<32x4xf32, #tpu.memory_space<vmem>>, vector<32x1xf32>
    %c0_24 = arith.constant 0 : index
    %c0_25 = arith.constant 0 : index
    %57 = vector.load %arg4[%c0_24, %c0_25] : memref<32x32xf32, #tpu.memory_space<vmem>>, vector<32x32xf32>
    %cst_26 = arith.constant dense<0.000000e+00> : vector<32x2xf32>
    %58 = tpu.matmul %57, %54, %cst_26 {dimension_numbers = #tpu.dot_dimension_numbers<[1], [0], [0], [1], [0, 0, 1, 1], [], []>} : vector<32x32xf32>, vector<32x2xf32>, vector<32x2xf32> -> vector<32x2xf32>
    %59 = vector.broadcast %55 : vector<32x1xf32> to vector<32x2xf32>
    %60 = arith.addf %58, %59 : vector<32x2xf32>
    %c0_27 = arith.constant 0 : index
    %c0_28 = arith.constant 0 : index
    %61 = vector.load %arg5[%c0_27, %c0_28] : memref<32x32xf32, #tpu.memory_space<vmem>>, vector<32x32xf32>
    %cst_29 = arith.constant dense<0.000000e+00> : vector<32x2xf32>
    %62 = tpu.matmul %61, %60, %cst_29 {dimension_numbers = #tpu.dot_dimension_numbers<[1], [0], [0], [1], [0, 0, 1, 1], [], []>} : vector<32x32xf32>, vector<32x2xf32>, vector<32x2xf32> -> vector<32x2xf32>
    %63 = vector.broadcast %56 : vector<32x1xf32> to vector<32x2xf32>
    %64 = arith.addf %62, %63 : vector<32x2xf32>
    %cst_30 = arith.constant 0.000000e+00 : f32
    %65 = vector.broadcast %cst_30 : f32 to vector<32x2xf32>
    %66 = arith.subf %65, %64 : vector<32x2xf32>
    %67 = math.exp %66 : vector<32x2xf32>
    %cst_31 = arith.constant 1.000000e+00 : f32
    %68 = vector.broadcast %cst_31 : f32 to vector<32x2xf32>
    %69 = arith.addf %68, %67 : vector<32x2xf32>
    %cst_32 = arith.constant 1.000000e+00 : f32
    %70 = vector.broadcast %cst_32 : f32 to vector<32x2xf32>
    %71 = arith.divf %70, %69 : vector<32x2xf32>
    %c0_33 = arith.constant 0 : index
    %c0_34 = arith.constant 0 : index
    %72 = vector.load %arg0[%c0_33, %c0_34] : memref<32x512xf32, #tpu.memory_space<vmem>>, vector<32x256xf32>
    %c0_35 = arith.constant 0 : index
    %c0_36 = arith.constant 0 : index
    %73 = vector.load %arg6[%c0_35, %c0_36] : memref<32x512xf32, #tpu.memory_space<vmem>>, vector<32x256xf32>
    %74 = vector.extract_strided_slice %71 {offsets = [0, 0], sizes = [32, 1], strides = [1, 1]} : vector<32x2xf32> to vector<32x1xf32>
    %75 = arith.subf %73, %72 : vector<32x256xf32>
    %76 = vector.broadcast %74 : vector<32x1xf32> to vector<32x256xf32>
    %77 = arith.mulf %76, %75 : vector<32x256xf32>
    %78 = arith.addf %72, %77 : vector<32x256xf32>
    %c0_37 = arith.constant 0 : index
    %c0_38 = arith.constant 0 : index
    %79 = vector.load %arg6[%c0_37, %c0_38] : memref<32x512xf32, #tpu.memory_space<vmem>>, vector<32x256xf32>
    tpu.vector_store %arg6[%c0_37, %c0_38], %78 {strides = array<i32>} : memref<32x512xf32, #tpu.memory_space<vmem>>, vector<32x256xf32>,
    %c0_39 = arith.constant 0 : index
    %c256_40 = arith.constant 256 : index
    %80 = vector.load %arg0[%c0_39, %c256_40] : memref<32x512xf32, #tpu.memory_space<vmem>>, vector<32x256xf32>
    %c0_41 = arith.constant 0 : index
    %c256_42 = arith.constant 256 : index
    %81 = vector.load %arg6[%c0_41, %c256_42] : memref<32x512xf32, #tpu.memory_space<vmem>>, vector<32x256xf32>
    %82 = vector.extract_strided_slice %71 {offsets = [0, 1], sizes = [32, 1], strides = [1, 1]} : vector<32x2xf32> to vector<32x1xf32>
    %83 = arith.subf %81, %80 : vector<32x256xf32>
    %84 = vector.broadcast %82 : vector<32x1xf32> to vector<32x256xf32>
    %85 = arith.mulf %84, %83 : vector<32x256xf32>
    %86 = arith.addf %80, %85 : vector<32x256xf32>
    %c0_43 = arith.constant 0 : index
    %c256_44 = arith.constant 256 : index
    %87 = vector.load %arg6[%c0_43, %c256_44] : memref<32x512xf32, #tpu.memory_space<vmem>>, vector<32x256xf32>
    tpu.vector_store %arg6[%c0_43, %c256_44], %86 {strides = array<i32>} : memref<32x512xf32, #tpu.memory_space<vmem>>, vector<32x256xf32>,
    return
  }
}

</mosaic_0001>

<bundles_post_ra>
// kernel: skspp_forward.1
= control target key start
LH: loop header
LB: loop body
LE: loop exit
PB: predicated region body
PF: predicated region fallthrough
CT: control target
= control target key end

     0   :  { %v1723_v1 = vmov 0   ;;  %vm494_vm0 = vcmask 261120   ;;  %s1724_s11 = smov 1   ;;  %s2474_s1 = inlined_call_operand.vmem [shape: bf16[288,512], index: 1, kind: input, shape index: {}]   ;;  %s2475_s2 = inlined_call_operand.vmem [shape: bf16[32,288], index: 2, kind: input, shape index: {}]   ;;  %s2476_s3 = inlined_call_operand.vmem [shape: f32[32,4], index: 3, kind: input, shape index: {}]   ;;  %s2477_s0 = inlined_call_operand.vmem [shape: f32[32,512], index: 0, kind: input, shape index: {}]   ;;  %s2478_s4 = inlined_call_operand.vmem [shape: f32[32,32], index: 4, kind: input, shape index: {}]   ;;  %s2479_s5 = inlined_call_operand.vmem [shape: f32[32,32], index: 5, kind: input, shape index: {}]   ;;  %s2480_s6 = inlined_call_operand.vmem [shape: f32[32,512], index: 6, kind: output, shape index: {}]  }
   0x1   :  { %v1583_v0 = vld [vmem:[%s2474_s1 + $0x4] ss:$16 sps:$4 sm:$0xff]   ;;  %1571 = vset.pattern.permute.xlu0 %v1723_v1  ;;  %1572 = vset.pattern.permute.xlu1 %v1723_v1  ;;  %v1585_v2 = vld [vmem:[%s2474_s1 + $0xc] ss:$16 sps:$4 sm:$0xff]   ;;  %v1587_v3 = vld [vmem:[%s2474_s1] ss:$16 sps:$4 sm:$0xff]  }
   0x2   :  { %501 = vmatprep.subr.bf16.mxu0 %v1583_v0  ;;  %v1588_v4 = vld [vmem:[%s2474_s1 + $0x8] ss:$16 sps:$4 sm:$0xff]   ;;  %607 = vmatprep.subr.bf16.mxu1 %v1585_v2  ;;  %v1589_v5 = vld [vmem:[%s2474_s1 + $0x24] ss:$16 sps:$4 sm:$0xff]   ;;  %v1591_v6 = vld [vmem:[%s2474_s1 + $0x2c] ss:$16 sps:$4 sm:$0xff]  }
   0x3   :  { %502 = vmatpush1.bf16.msra.mxu0 %v1587_v3  ;;  %608 = vmatpush1.bf16.msra.mxu1 %v1588_v4  ;;  %v1593_v7 = vld [vmem:[%s2474_s1 + $0x20] ss:$16 sps:$4 sm:$0xff]   ;;  %v1594_v8 = vld [vmem:[%s2474_s1 + $0x28] ss:$16 sps:$4 sm:$0xff]   ;;  %v1595_v9 = vld [vmem:[%s2474_s1 + $0x44] ss:$16 sps:$4 sm:$0xff]  }
   0x4   :  { %503 = vmatprep.subr.bf16.mxu0 %v1589_v5  ;;  %609 = vmatprep.subr.bf16.mxu1 %v1591_v6  ;;  %v1597_v10 = vld [vmem:[%s2474_s1 + $0x4c] ss:$16 sps:$4 sm:$0xff]   ;;  %v1599_v11 = vld [vmem:[%s2474_s1 + $0x40] ss:$16 sps:$4 sm:$0xff]   ;;  %v1600_v12 = vld [vmem:[%s2474_s1 + $0x48] ss:$16 sps:$4 sm:$0xff]  }
   0x5   :  { %v1601_v13 = vld [vmem:[%s2474_s1 + $0x64] ss:$16 sps:$4 sm:$0xff]   ;;  %v1603_v14 = vld [vmem:[%s2474_s1 + $0x6c] ss:$16 sps:$4 sm:$0xff]   ;;  %v1605_v15 = vld [vmem:[%s2474_s1 + $0x60] ss:$16 sps:$4 sm:$0xff]  }
   0x6   :  { %v1606_v16 = vld [vmem:[%s2474_s1 + $0x68] ss:$16 sps:$4 sm:$0xff]   ;;  %v1607_v17 = vld [vmem:[%s2474_s1 + $0x84] ss:$16 sps:$4 sm:$0xff]   ;;  %v1609_v18 = vld [vmem:[%s2474_s1 + $0x8c] ss:$16 sps:$4 sm:$0xff]  }
   0x7   :  { %504 = vmatpush1.bf16.msra.mxu0 %v1593_v7  ;;  %610 = vmatpush1.bf16.msra.mxu1 %v1594_v8  ;;  %v1611_v19 = vld [vmem:[%s2474_s1 + $0x80] ss:$16 sps:$4 sm:$0xff]   ;;  %v1612_v20 = vld [vmem:[%s2474_s1 + $0x88] ss:$16 sps:$4 sm:$0xff]   ;;  %v1613_v21 = vld [vmem:[%s2474_s1 + $0xa4] ss:$16 sps:$4 sm:$0xff]  }
   0x8   :  { %505 = vmatprep.subr.bf16.mxu0 %v1595_v9  ;;  %611 = vmatprep.subr.bf16.mxu1 %v1597_v10  ;;  %v1615_v22 = vld [vmem:[%s2474_s1 + $0xac] ss:$16 sps:$4 sm:$0xff]   ;;  %v1617_v23 = vld [vmem:[%s2474_s1 + $0xa0] ss:$16 sps:$4 sm:$0xff]   ;;  %v1618_v24 = vld [vmem:[%s2474_s1 + $0xa8] ss:$16 sps:$4 sm:$0xff]  }
   0x9   :  { %v1619_v25 = vld [vmem:[%s2474_s1 + $0xc4] ss:$16 sps:$4 sm:$0xff]   ;;  %v1621_v26 = vld [vmem:[%s2474_s1 + $0xcc] ss:$16 sps:$4 sm:$0xff]   ;;  %v1623_v27 = vld [vmem:[%s2474_s1 + $0xc0] ss:$16 sps:$4 sm:$0xff]  }
   0xa   :  { %v1624_v28 = vld [vmem:[%s2474_s1 + $0xc8] ss:$16 sps:$4 sm:$0xff]   ;;  %v1625_v29 = vld [vmem:[%s2474_s1 + $0xe4] ss:$16 sps:$4 sm:$0xff]   ;;  %v1627_v30 = vld [vmem:[%s2474_s1 + $0xec] ss:$16 sps:$4 sm:$0xff]  }
   0xb   :  { %506 = vmatpush1.bf16.msra.mxu0 %v1599_v11  ;;  %612 = vmatpush1.bf16.msra.mxu1 %v1600_v12  ;;  %v1629_v31 = vld [vmem:[%s2474_s1 + $0xe0] ss:$16 sps:$4 sm:$0xff]   ;;  %v1630_v32 = vld [vmem:[%s2474_s1 + $0xe8] ss:$16 sps:$4 sm:$0xff]   ;;  %v1631_v33 = vld [vmem:[%s2474_s1 + $0x104] ss:$16 sps:$4 sm:$0xff]  }
   0xc   :  { %507 = vmatprep.subr.bf16.mxu0 %v1601_v13  ;;  %613 = vmatprep.subr.bf16.mxu1 %v1603_v14  ;;  %v1633_v34 = vld [vmem:[%s2474_s1 + $0x10c] ss:$16 sps:$4 sm:$0xff]   ;;  %v1635_v35 = vld [vmem:[%s2474_s1 + $0x100] ss:$16 sps:$4 sm:$0xff]   ;;  %v1636_v36 = vld [vmem:[%s2474_s1 + $0x108] ss:$16 sps:$4 sm:$0xff]  }
   0xd   :  { %v1637_v37 = vld [vmem:[%s2474_s1 + $0x124] ss:$16 sps:$4 sm:$0xff]   ;;  %v1639_v38 = vld [vmem:[%s2474_s1 + $0x12c] ss:$16 sps:$4 sm:$0xff]   ;;  %v1641_v39 = vld [vmem:[%s2474_s1 + $0x120] ss:$16 sps:$4 sm:$0xff]  }
   0xe   :  { %v1642_v40 = vld [vmem:[%s2474_s1 + $0x128] ss:$16 sps:$4 sm:$0xff]   ;;  %v1643_v41 = vld [vmem:[%s2474_s1 + $0x144] ss:$16 sps:$4 sm:$0xff]   ;;  %v1645_v42 = vld [vmem:[%s2474_s1 + $0x14c] ss:$16 sps:$4 sm:$0xff]  }
   0xf   :  { %508 = vmatpush1.bf16.msra.mxu0 %v1605_v15  ;;  %614 = vmatpush1.bf16.msra.mxu1 %v1606_v16  ;;  %v1647_v43 = vld [vmem:[%s2474_s1 + $0x140] ss:$16 sps:$4 sm:$0xff]   ;;  %v1648_v44 = vld [vmem:[%s2474_s1 + $0x148] ss:$16 sps:$4 sm:$0xff]   ;;  %v1649_v45 = vld [vmem:[%s2474_s1 + $0x164] ss:$16 sps:$4 sm:$0xff]  }
  0x10   :  { %509 = vmatprep.subr.bf16.mxu0 %v1607_v17  ;;  %615 = vmatprep.subr.bf16.mxu1 %v1609_v18  ;;  %v1651_v46 = vld [vmem:[%s2474_s1 + $0x16c] ss:$16 sps:$4 sm:$0xff]   ;;  %v1653_v47 = vld [vmem:[%s2474_s1 + $0x160] ss:$16 sps:$4 sm:$0xff]   ;;  %v1654_v48 = vld [vmem:[%s2474_s1 + $0x168] ss:$16 sps:$4 sm:$0xff]  }
  0x11   :  { %v1681_v49 = vld [vmem:[%s2475_s2 + $0x4] ss:$12 sps:$4 sm:$0xff]   ;;  %v1657_v51 = vld [vmem:[%s2474_s1 + $0x18c] ss:$16 sps:$4 sm:$0xff]   ;;  %v1660_v53 = vld [vmem:[%s2474_s1 + $0x188] ss:$16 sps:$4 sm:$0xff]  }
  0x12   :  { %v1655_v50 = vld [vmem:[%s2474_s1 + $0x184] ss:$16 sps:$4 sm:$0xff]   ;;  %533 = vmatprep.mubr.bf16.mxu0 %v1681_v49  ;;  %639 = vmatprep.mubr.bf16.mxu1 %v1681_v49  ;;  %v1659_v52 = vld [vmem:[%s2474_s1 + $0x180] ss:$16 sps:$4 sm:$0xff]   ;;  %v1663_v55 = vld [vmem:[%s2474_s1 + $0x1ac] ss:$16 sps:$4 sm:$0xff]  }
  0x13   :  { %510 = vmatpush1.bf16.msra.mxu0 %v1611_v19  ;;  %616 = vmatpush1.bf16.msra.mxu1 %v1612_v20  ;;  %v1661_v54 = vld [vmem:[%s2474_s1 + $0x1a4] ss:$16 sps:$4 sm:$0xff]   ;;  %v1665_v56 = vld [vmem:[%s2474_s1 + $0x1a0] ss:$16 sps:$4 sm:$0xff]   ;;  %v1666_v57 = vld [vmem:[%s2474_s1 + $0x1a8] ss:$16 sps:$4 sm:$0xff]  }
  0x14   :  { %511 = vmatprep.subr.bf16.mxu0 %v1613_v21  ;;  %617 = vmatprep.subr.bf16.mxu1 %v1615_v22  ;;  %v1667_v58 = vld [vmem:[%s2474_s1 + $0x1c4] ss:$16 sps:$4 sm:$0xff]   ;;  %v1669_v59 = vld [vmem:[%s2474_s1 + $0x1cc] ss:$16 sps:$4 sm:$0xff]   ;;  %v1671_v60 = vld [vmem:[%s2474_s1 + $0x1c0] ss:$16 sps:$4 sm:$0xff]  }
  0x15   :  { %v1672_v61 = vld [vmem:[%s2474_s1 + $0x1c8] ss:$16 sps:$4 sm:$0xff]   ;;  %v1673_v62 = vld [vmem:[%s2474_s1 + $0x1e4] ss:$16 sps:$4 sm:$0xff]   ;;  %v1675_v63 = vld [vmem:[%s2474_s1 + $0x1ec] ss:$16 sps:$4 sm:$0xff]  }
  0x16   :  { %v1677_v0 = vld [vmem:[%s2474_s1 + $0x1e0] ss:$16 sps:$4 sm:$0xff]   ;;  %v1678_v2 = vld [vmem:[%s2474_s1 + $0x1e8] ss:$16 sps:$4 sm:$0xff]   ;;  %v1687_v3 = vld [vmem:[%s2474_s1 + $0x204] ss:$16 sps:$4 sm:$0xff]  }
  0x17   :  { %512 = vmatpush1.bf16.msra.mxu0 %v1617_v23  ;;  %618 = vmatpush1.bf16.msra.mxu1 %v1618_v24  ;;  %v1690_v4 = vld [vmem:[%s2474_s1 + $0x20c] ss:$16 sps:$4 sm:$0xff]   ;;  %v1685_v7 = vld [vmem:[%s2474_s1 + $0x200] ss:$16 sps:$4 sm:$0xff]   ;;  %v1688_v8 = vld [vmem:[%s2474_s1 + $0x208] ss:$16 sps:$4 sm:$0xff]  }
  0x18   :  { %513 = vmatprep.subr.bf16.mxu0 %v1619_v25  ;;  %619 = vmatprep.subr.bf16.mxu1 %v1621_v26  ;;  %v1679_v5 = vld [vmem:[%s2475_s2] ss:$12 sps:$4 sm:$0xff]   ;;  %v1682_v6 = vld [vmem:[%s2475_s2 + $0x1c] ss:$12 sps:$4 sm:$0xff]   ;;  %v1693_v9 = vld [vmem:[%s2474_s1 + $0x224] ss:$16 sps:$4 sm:$0xff]  }
  0x19   :  { %v1696_v10 = vld [vmem:[%s2474_s1 + $0x22c] ss:$16 sps:$4 sm:$0xff]   ;;  %v1691_v11 = vld [vmem:[%s2474_s1 + $0x220] ss:$16 sps:$4 sm:$0xff]   ;;  %v1694_v12 = vld [vmem:[%s2474_s1 + $0x228] ss:$16 sps:$4 sm:$0xff]  }
  0x1a   :  { %v1684_v13 = vld [vmem:[%s2475_s2 + $0x18] ss:$12 sps:$4 sm:$0xff]   ;;  %v1697_v14 = vld [vmem:[%s2475_s2 + $0x8] ss:$12 sps:$4 sm:$0xff]   ;;  %v1698_v15 = vld [vmem:[%s2475_s2 + $0x20] ss:$12 sps:$4 sm:$0xff]  }
  0x1b   :  { %514 = vmatpush1.bf16.msra.mxu0 %v1623_v27  ;;  %620 = vmatpush1.bf16.msra.mxu1 %v1624_v28 }
  0x1c   :  { %515 = vmatprep.subr.bf16.mxu0 %v1625_v29  ;;  %621 = vmatprep.subr.bf16.mxu1 %v1627_v30 }
  0x1f   :  { %516 = vmatpush1.bf16.msra.mxu0 %v1629_v31  ;;  %622 = vmatpush1.bf16.msra.mxu1 %v1630_v32 }
  0x20   :  { %517 = vmatprep.subr.bf16.mxu0 %v1631_v33  ;;  %623 = vmatprep.subr.bf16.mxu1 %v1633_v34 }
  0x23   :  { %518 = vmatpush1.bf16.msra.mxu0 %v1635_v35  ;;  %624 = vmatpush1.bf16.msra.mxu1 %v1636_v36 }
  0x24   :  { %519 = vmatprep.subr.bf16.mxu0 %v1637_v37  ;;  %625 = vmatprep.subr.bf16.mxu1 %v1639_v38 }
  0x27   :  { %520 = vmatpush1.bf16.msra.mxu0 %v1641_v39  ;;  %626 = vmatpush1.bf16.msra.mxu1 %v1642_v40 }
  0x28   :  { %521 = vmatprep.subr.bf16.mxu0 %v1643_v41  ;;  %627 = vmatprep.subr.bf16.mxu1 %v1645_v42 }
  0x2b   :  { %522 = vmatpush1.bf16.msra.mxu0 %v1647_v43  ;;  %628 = vmatpush1.bf16.msra.mxu1 %v1648_v44 }
  0x2c   :  { %523 = vmatprep.subr.bf16.mxu0 %v1649_v45  ;;  %629 = vmatprep.subr.bf16.mxu1 %v1651_v46 }
  0x2f   :  { %524 = vmatpush1.bf16.msra.mxu0 %v1653_v47  ;;  %630 = vmatpush1.bf16.msra.mxu1 %v1654_v48 }
  0x30   :  { %525 = vmatprep.subr.bf16.mxu0 %v1655_v50  ;;  %631 = vmatprep.subr.bf16.mxu1 %v1657_v51 }
  0x33   :  { %526 = vmatpush1.bf16.msra.mxu0 %v1659_v52  ;;  %632 = vmatpush1.bf16.msra.mxu1 %v1660_v53 }
  0x34   :  { %527 = vmatprep.subr.bf16.mxu0 %v1661_v54  ;;  %633 = vmatprep.subr.bf16.mxu1 %v1663_v55 }
  0x37   :  { %528 = vmatpush1.bf16.msra.mxu0 %v1665_v56  ;;  %634 = vmatpush1.bf16.msra.mxu1 %v1666_v57 }
  0x38   :  { %529 = vmatprep.subr.bf16.mxu0 %v1667_v58  ;;  %635 = vmatprep.subr.bf16.mxu1 %v1669_v59 }
  0x3b   :  { %530 = vmatpush1.bf16.msra.mxu0 %v1671_v60  ;;  %636 = vmatpush1.bf16.msra.mxu1 %v1672_v61 }
  0x3c   :  { %531 = vmatprep.subr.bf16.mxu0 %v1673_v62  ;;  %637 = vmatprep.subr.bf16.mxu1 %v1675_v63 }
  0x3f   :  { %532 = vmatpush1.bf16.msra.mxu0 %v1677_v0  ;;  %638 = vmatpush1.bf16.msra.mxu1 %v1678_v2 }
  0x40   :  { %554 = vmatprep.subr.bf16.mxu0 %v1687_v3  ;;  %660 = vmatprep.subr.bf16.mxu1 %v1690_v4 }
  0x42   :  { %534 = vmatmul.mubr.bf16.vlgmr.msra.gmra.mrb[0].mxu0 %v1679_v5  ;;  %640 = vmatmul.mubr.bf16.vlgmr.msra.gmra.mrb[0].mxu1 %v1679_v5 }
  0x43   :  { %543 = vmatprep.mubr.bf16.mxu0 %v1682_v6  ;;  %649 = vmatprep.mubr.bf16.mxu1 %v1682_v6 }
  0x44   :  { %555 = vmatpush1.bf16.msra.mxu0 %v1685_v7  ;;  %661 = vmatpush1.bf16.msra.mxu1 %v1688_v8 }
  0x45   :  { %556 = vmatprep.subr.bf16.mxu0 %v1693_v9  ;;  %662 = vmatprep.subr.bf16.mxu1 %v1696_v10 }
  0x48   :  { %557 = vmatpush1.bf16.msra.mxu0 %v1691_v11  ;;  %663 = vmatpush1.bf16.msra.mxu1 %v1694_v12 }
  0x4a   :  { %544 = vmatmul.mubr.bf16.gmra.mrb[4].mxu0 %v1684_v13  ;;  %650 = vmatmul.mubr.bf16.gmra.mrb[4].mxu1 %v1684_v13 }
  0x4b   :  { %586 = vmatprep.mubr.bf16.mxu0 %v1723_v1  ;;  %692 = vmatprep.mubr.bf16.mxu1 %v1723_v1 }
  0x52   :  { %1478 = vmatmul.mubr.msk.bf16.vlgmr.msra.gmra.mrb[0].mxu0 %vm494_vm0, %v1697_v14  ;;  %1480 = vmatmul.mubr.msk.bf16.vlgmr.msra.gmra.mrb[0].mxu1 %vm494_vm0, %v1697_v14 }
  0x53   :  { %596 = vmatprep.mubr.bf16.mxu0 %v1723_v1  ;;  %702 = vmatprep.mubr.bf16.mxu1 %v1723_v1 }
  0x5a   :  { %1479 = vmatmul.mubr.msk.bf16.gmra.mrb[4].mxu0 %vm494_vm0, %v1698_v15  ;;  %1481 = vmatmul.mubr.msk.bf16.gmra.mrb[4].mxu1 %vm494_vm0, %v1698_v15 }
 0x125   :  { %v2007_v16 = vpop.f32.mrb[0].mxu0  ;;  %v2009_v17 = vpop.f32.mrb[0].mxu1 }
 0x126   :  { %v738_v18 = vmul.f32 %v2007_v16, %v2007_v16  ;;  %v2013_v19 = vpop.f32.mrb[1].mxu0  ;;  %v2015_v20 = vpop.f32.mrb[1].mxu1  ;;  %v740_v25 = vmul.f32 %v2009_v17, %v2009_v17 }
 0x127   :  { %v713_v21 = vadd.f32 %v2013_v19, %v2007_v16  ;;  %v739_v22 = vmul.f32 %v2013_v19, %v2013_v19  ;;  %v2021_v23 = vpop.f32.mrb[2].mxu0  ;;  %v2023_v24 = vpop.f32.mrb[2].mxu1  ;;  %v741_v34 = vmul.f32 %v2015_v20, %v2015_v20 }
 0x128   :  { %v742_v26 = vmul.f32 %v2021_v23, %v2021_v23  ;;  %v2029_v27 = vpop.f32.mrb[3].mxu0  ;;  %v2031_v28 = vpop.f32.mrb[3].mxu1  ;;  %v744_v33 = vmul.f32 %v2023_v24, %v2023_v24 }
 0x129   :  { %v718_v29 = vadd.f32 %v2029_v27, %v2021_v23  ;;  %v743_v30 = vmul.f32 %v2029_v27, %v2029_v27  ;;  %v714_v31 = vadd.f32 %v713_v21, %v2009_v17  ;;  %v754_v32 = vadd.f32 %v739_v22, %v738_v18 }
 0x12a   :  { %v745_v43 = vmul.f32 %v2031_v28, %v2031_v28 }
 0x12b   :  { %v715_v35 = vadd.f32 %v714_v31, %v2015_v20  ;;  %v755_v36 = vadd.f32 %v754_v32, %v740_v25  ;;  %v719_v37 = vadd.f32 %v718_v29, %v2023_v24  ;;  %v759_v38 = vadd.f32 %v743_v30, %v742_v26 }
 0x12d   :  { %v2044_v39 = vpop.f32.mrb[4].mxu1  ;;  %716 = vadd.xlane.f32.xlu0 %v715_v35  ;;  %v2046_v40 = vpop.f32.mrb[4].mxu0  ;;  %v756_v41 = vadd.f32 %v755_v36, %v741_v34  ;;  %v720_v42 = vadd.f32 %v719_v37, %v2031_v28  ;;  %v760_v44 = vadd.f32 %v759_v38, %v744_v33 }
 0x12e   :  { %v746_v45 = vmul.f32 %v2046_v40, %v2046_v40  ;;  %v2053_v46 = vpop.f32.mrb[5].mxu0  ;;  %v2055_v47 = vpop.f32.mrb[5].mxu1  ;;  %v748_v53 = vmul.f32 %v2044_v39, %v2044_v39 }
 0x12f   :  { %v723_v48 = vadd.f32 %v2053_v46, %v2046_v40  ;;  %v747_v49 = vmul.f32 %v2053_v46, %v2053_v46  ;;  %v2061_v50 = vpop.f32.mrb[6].mxu1  ;;  %757 = vadd.xlane.f32.xlu1 %v756_v41  ;;  %v2063_v51 = vpop.f32.mrb[6].mxu0  ;;  %v761_v52 = vadd.f32 %v760_v44, %v745_v43  ;;  %v749_v62 = vmul.f32 %v2055_v47, %v2055_v47 }
 0x130   :  { %v750_v54 = vmul.f32 %v2063_v51, %v2063_v51  ;;  %v2069_v55 = vpop.f32.mrb[7].mxu0  ;;  %v2071_v56 = vpop.f32.mrb[7].mxu1  ;;  %v752_v61 = vmul.f32 %v2061_v50, %v2061_v50 }
 0x131   :  { %v728_v57 = vadd.f32 %v2069_v55, %v2063_v51  ;;  %v751_v58 = vmul.f32 %v2069_v55, %v2069_v55  ;;  %721 = vadd.xlane.f32.xlu0 %v720_v42  ;;  %v724_v59 = vadd.f32 %v723_v48, %v2044_v39  ;;  %v764_v60 = vadd.f32 %v747_v49, %v746_v45  ;;  %v2090_v48 = vld [vmem:[%s2476_s3] sm:$0xff] }
 0x132   :  { %v753_v6 = vmul.f32 %v2071_v56, %v2071_v56 }
 0x133   :  { %762 = vadd.xlane.f32.xlu1 %v761_v52  ;;  %v725_v63 = vadd.f32 %v724_v59, %v2055_v47  ;;  %v729_v0 = vadd.f32 %v728_v57, %v2061_v50  ;;  %v765_v2 = vadd.f32 %v764_v60, %v748_v53  ;;  %v769_v3 = vadd.f32 %v751_v58, %v750_v54  ;;  %v2096_v54 = vld [vmem:[%s2476_s3 + $0x8] sm:$0xff] }
 0x135   :  { %726 = vadd.xlane.f32.xlu0 %v725_v63  ;;  %v730_v4 = vadd.f32 %v729_v0, %v2071_v56  ;;  %v766_v5 = vadd.f32 %v765_v2, %v749_v62  ;;  %v770_v7 = vadd.f32 %v769_v3, %v752_v61  ;;  %v2102_v61 = vld [vmem:[%s2476_s3 + $0x10] sm:$0xff]  ;;  %v2107_v63 = vld [vmem:[%s2476_s3 + $0x18] sm:$0xff] }
 0x137   :  { %731 = vadd.xlane.f32.xlu1 %v730_v4  ;;  %v771_v8 = vadd.f32 %v770_v7, %v753_v6 }
 0x139   :  { %767 = vadd.xlane.f32.xlu0 %v766_v5  ;;  %v1725_v5 = vmov 1  }
 0x13b   :  { %772 = vadd.xlane.f32.xlu1 %v771_v8 }
 0x1ba   :  { %v717_v9 = vpop.xlane.xlu0 %716 }
 0x1bb   :  { %v734_v10 = vmul.f32 0.001953125, %v717_v9 }
 0x1bc   :  { %v758_v11 = vpop.xlane.xlu1 %757 }
 0x1bd   :  { %v778_v12 = vmul.f32 %v734_v10, %v734_v10  ;;  %v774_v13 = vmul.f32 0.001953125, %v758_v11 }
 0x1be   :  { %v722_v14 = vpop.xlane.xlu0 %721 }
 0x1bf   :  { %v782_v15 = vsub.f32 %v774_v13, %v778_v12  ;;  %v735_v18 = vmul.f32 0.001953125, %v722_v14 }
 0x1c0   :  { %v763_v21 = vpop.xlane.xlu1 %762 }
 0x1c1   :  { %v790_v22 = vadd.f32 1e-05, %v782_v15  ;;  %v779_v25 = vmul.f32 %v735_v18, %v735_v18  ;;  %v775_v26 = vmul.f32 0.001953125, %v763_v21 }
 0x1c2   :  { %v727_v29 = vpop.xlane.xlu0 %726 }
 0x1c3   :  { %1699 = vrsqrt.f32 %v790_v22  ;;  %v783_v30 = vsub.f32 %v775_v26, %v779_v25  ;;  %v736_v31 = vmul.f32 0.001953125, %v727_v29 }
 0x1c4   :  { %v732_v32 = vpop.xlane.xlu1 %731 }
 0x1c5   :  { %v791_v33 = vadd.f32 1e-05, %v783_v30  ;;  %v737_v34 = vmul.f32 0.001953125, %v732_v32  ;;  %v780_v36 = vmul.f32 %v736_v31, %v736_v31 }
 0x1c6   :  { %v768_v35 = vpop.xlane.xlu0 %767 }
 0x1c7   :  { %1701 = vrsqrt.f32 %v791_v33  ;;  %v776_v37 = vmul.f32 0.001953125, %v768_v35  ;;  %v781_v41 = vmul.f32 %v737_v34, %v737_v34 }
 0x1c8   :  { %v773_v38 = vpop.xlane.xlu1 %772 }
 0x1c9   :  { %v784_v42 = vsub.f32 %v776_v37, %v780_v36  ;;  %v777_v43 = vmul.f32 0.001953125, %v773_v38 }
 0x1cb   :  { %v792_v44 = vadd.f32 1e-05, %v784_v42  ;;  %v785_v45 = vsub.f32 %v777_v43, %v781_v41  ;;  %v2155_v41 = vld [vmem:[%s2477_s0 + $0x18] sm:$0xff] }
 0x1cd   :  { %v1700_v49 = vpop.eup %1699  ;;  %1703 = vrsqrt.f32 %v792_v44  ;;  %v793_v52 = vadd.f32 1e-05, %v785_v45 }
 0x1ce   :  { %v798_v53 = vmul.f32 %v1700_v49, %v2090_v48 }
 0x1cf   :  { %1705 = vrsqrt.f32 %v793_v52 }
 0x1d0   :  { %v802_v57 = vmul.f32 %v798_v53, %v734_v10 }
 0x1d1   :  { %v1702_v58 = vpop.eup %1701 }
 0x1d2   :  { %810 = vrot.lane.b32.xlu0 %v802_v57, %s1724_s11  ;;  %v799_v59 = vmul.f32 %v1702_v58, %v2096_v54  ;;  %v2170_v57 = vld [vmem:[%s2477_s0 + $0x20] sm:$0xff]  ;;  %v2181_v58 = vld [vmem:[%s2477_s0 + $0x28] sm:$0xff] }
 0x1d4   :  { %v803_v60 = vmul.f32 %v799_v59, %v735_v18 }
 0x1d6   :  { %828 = vperm.xlu0 %1571, %v798_v53   ;;  %812 = vrot.lane.b32.xlu1 %v803_v60, %s1724_s11 }
 0x1d7   :  { %v1704_v62 = vpop.eup %1703 }
 0x1d8   :  { %v800_v0 = vmul.f32 %v1704_v62, %v2102_v61  ;;  %v2192_v62 = vld [vmem:[%s2477_s0 + $0x30] sm:$0xff] }
 0x1d9   :  { %v1706_v2 = vpop.eup %1705 }
 0x1da   :  { %v804_v3 = vmul.f32 %v800_v0, %v736_v31  ;;  %v801_v4 = vmul.f32 %v1706_v2, %v2107_v63  ;;  %1574 = vset.pattern.permute.xlu0 %v1725_v5 }
 0x1dc   :  { %814 = vrot.lane.b32.xlu1 %v804_v3, %s1724_s11  ;;  %v805_v6 = vmul.f32 %v801_v4, %v737_v34 }
 0x1e0   :  { %816 = vrot.lane.b32.xlu1 %v805_v6, %s1724_s11 }
 0x1e4   :  { %833 = vperm.xlu1 %1572, %v799_v59  }
 0x1e8   :  { %838 = vperm.xlu1 %1572, %v800_v0   ;;  %v2197_v0 = vld [vmem:[%s2477_s0 + $0x38] sm:$0xff] }
 0x1ec   :  { %843 = vperm.xlu1 %1572, %v801_v4  }
 0x1f0   :  { %1573 = vset.pattern.permute.xlu1 %v1725_v5 }
 0x244   :  { %v811_v7 = vpop.permute.xlu0 %810 }
 0x245   :  { %v822_v8 = vsub.f32 %v2090_v48, %v811_v7 }
 0x247   :  { %864 = vperm.xlu1 %1573, %v822_v8  }
 0x248   :  { %v813_v9 = vpop.permute.xlu1 %812 }
 0x249   :  { %v823_v10 = vsub.f32 %v2096_v54, %v813_v9 }
 0x24b   :  { %869 = vperm.xlu0 %1574, %v823_v10  }
 0x24e   :  { %v815_v11 = vpop.permute.xlu1 %814 }
 0x24f   :  { %v824_v12 = vsub.f32 %v2102_v61, %v815_v11 }
 0x251   :  { %874 = vperm.xlu0 %1574, %v824_v12  }
 0x252   :  { %v817_v13 = vpop.permute.xlu1 %816 }
 0x253   :  { %v825_v14 = vsub.f32 %v2107_v63, %v817_v13 }
 0x255   :  { %879 = vperm.xlu1 %1573, %v825_v14   ;;  %v829_v21 = vpop.permute.xlu0 %828 }
 0x256   :  { %v846_v25 = vmul.f32 %v829_v21, %v2007_v16  ;;  %v847_v26 = vmul.f32 %v829_v21, %v2013_v19  ;;  %v848_v29 = vmul.f32 %v829_v21, %v2009_v17  ;;  %v849_v30 = vmul.f32 %v829_v21, %v2015_v20  ;;  %v2136_v17 = vld [vmem:[%s2477_s0] sm:$0xff]  ;;  %v2141_v20 = vld [vmem:[%s2477_s0 + $0x8] sm:$0xff] }
 0x263   :  { %v834_v15 = vpop.permute.xlu1 %833 }
 0x264   :  { %v850_v36 = vmul.f32 %v834_v15, %v2021_v23  ;;  %v851_v37 = vmul.f32 %v834_v15, %v2029_v27  ;;  %v852_v16 = vmul.f32 %v834_v15, %v2023_v24  ;;  %v853_v19 = vmul.f32 %v834_v15, %v2031_v28  ;;  %v2150_v28 = vld [vmem:[%s2477_s0 + $0x10] sm:$0xff] }
 0x267   :  { %v839_v18 = vpop.permute.xlu1 %838 }
 0x268   :  { %v854_v42 = vmul.f32 %v839_v18, %v2046_v40  ;;  %v855_v43 = vmul.f32 %v839_v18, %v2053_v46  ;;  %v856_v7 = vmul.f32 %v839_v18, %v2044_v39  ;;  %v857_v8 = vmul.f32 %v839_v18, %v2055_v47 }
 0x26b   :  { %v844_v22 = vpop.permute.xlu1 %843 }
 0x26c   :  { %v858_v47 = vmul.f32 %v844_v22, %v2063_v51  ;;  %v859_v14 = vmul.f32 %v844_v22, %v2069_v55  ;;  %v2232_v51 = vld [vmem:[%s2477_s0 + $0x40] sm:$0xff]  ;;  %v2237_v55 = vld [vmem:[%s2477_s0 + $0x48] sm:$0xff] }
 0x2c6   :  { %v865_v31 = vpop.permute.xlu1 %864 }
 0x2c7   :  { %v2121_v32 = vadd.f32 %v865_v31, %v846_v25  ;;  %v2123_v33 = vadd.f32 %v865_v31, %v847_v26  ;;  %v2125_v34 = vadd.f32 %v865_v31, %v848_v29  ;;  %v2127_v35 = vadd.f32 %v865_v31, %v849_v30 }
 0x2c8   :  { %v860_v29 = vmul.f32 %v844_v22, %v2061_v50  ;;  %v861_v30 = vmul.f32 %v844_v22, %v2071_v56  ;;  %v2246_v22 = vld [vmem:[%s2477_s0 + $0x50] sm:$0xff] }
 0x2c9   :  { %v898_v38 = vmax.f32 %v2121_v32, 0.0  ;;  %v2489_v23 = vmax.f32 %v2123_v33, 0.0  ;;  %v900_v27 = vmax.f32 %v2125_v34, 0.0  ;;  %v901_v24 = vmax.f32 %v2127_v35, 0.0 }
 0x2ca   :  { %v870_v44 = vpop.permute.xlu0 %869 }
 0x2cb   :  { %v2159_v45 = vadd.f32 %v870_v44, %v850_v36  ;;  %v2161_v49 = vadd.f32 %v870_v44, %v851_v37  ;;  %v2163_v52 = vadd.f32 %v870_v44, %v852_v16  ;;  %v2165_v53 = vadd.f32 %v870_v44, %v853_v19  ;;  %v2251_v19 = vld [vmem:[%s2477_s0 + $0x58] sm:$0xff] }
 0x2cc   :  { %v940_v40 = vadd.f32 %v2136_v17, %v898_v38  ;;  %v941_v46 = vadd.f32 %v2141_v20, %v2489_v23  ;;  %v977_v59 = vadd.f32 %v2150_v28, %v900_v27  ;;  %v978_v60 = vadd.f32 %v2155_v41, %v901_v24 }
 0x2cd   :  { %v902_v2 = vmax.f32 %v2159_v45, 0.0  ;;  %v903_v3 = vmax.f32 %v2161_v49, 0.0  ;;  %v904_v4 = vmax.f32 %v2163_v52, 0.0  ;;  %v905_v6 = vmax.f32 %v2165_v53, 0.0 }
 0x2ce   :  { %v948_v9 = vadd.f32 %v941_v46, %v940_v40  ;;  %v985_v10 = vadd.f32 %v978_v60, %v977_v59  ;;  %v2264_v59 = vld [vmem:[%s2477_s0 + $0x60] sm:$0xff]  ;;  %v1348_v45 = vsub.f32 %v900_v27, %v2150_v28  ;;  %v1349_v49 = vsub.f32 %v901_v24, %v2155_v41 }
 0x2cf   :  { %v942_v11 = vadd.f32 %v2170_v57, %v902_v2  ;;  %v943_v12 = vadd.f32 %v2181_v58, %v903_v3  ;;  %v979_v13 = vadd.f32 %v2192_v62, %v904_v4  ;;  %v980_v39 = vadd.f32 %v2197_v0, %v905_v6 }
 0x2d0   :  { %949 = vadd.xlane.f32.xlu0 %v948_v9  ;;  %v875_v15 = vpop.permute.xlu0 %874 }
 0x2d1   :  { %v2219_v18 = vadd.f32 %v875_v15, %v854_v42  ;;  %v2221_v21 = vadd.f32 %v875_v15, %v855_v43  ;;  %v2223_v25 = vadd.f32 %v875_v15, %v856_v7  ;;  %v2225_v26 = vadd.f32 %v875_v15, %v857_v8  ;;  %v2275_v8 = vld [vmem:[%s2477_s0 + $0x68] sm:$0xff] }
 0x2d2   :  { %v951_v31 = vadd.f32 %v943_v12, %v942_v11  ;;  %v988_v36 = vadd.f32 %v980_v39, %v979_v13  ;;  %v2286_v11 = vld [vmem:[%s2477_s0 + $0x70] sm:$0xff]  ;;  %v2291_v12 = vld [vmem:[%s2477_s0 + $0x78] sm:$0xff] }
 0x2d3   :  { %v2484_v37 = vmax.f32 %v2219_v18, 0.0  ;;  %v2483_v16 = vmax.f32 %v2221_v21, 0.0  ;;  %v2482_v50 = vmax.f32 %v2223_v25, 0.0  ;;  %v2481_v56 = vmax.f32 %v2225_v26, 0.0 }
 0x2d4   :  { %952 = vadd.xlane.f32.xlu1 %v951_v31  ;;  %986 = vadd.xlane.f32.xlu0 %v985_v10  ;;  %v880_v42 = vpop.permute.xlu1 %879 }
 0x2d5   :  { %v2253_v43 = vadd.f32 %v880_v42, %v858_v47  ;;  %v2255_v44 = vadd.f32 %v880_v42, %v859_v14  ;;  %v2257_v40 = vadd.f32 %v880_v42, %v860_v29  ;;  %v2259_v46 = vadd.f32 %v880_v42, %v861_v30 }
 0x2d6   :  { %v944_v60 = vadd.f32 %v2232_v51, %v2484_v37  ;;  %v945_v7 = vadd.f32 %v2237_v55, %v2483_v16  ;;  %v981_v9 = vadd.f32 %v2246_v22, %v2482_v50  ;;  %v982_v10 = vadd.f32 %v2251_v19, %v2481_v56 }
 0x2d7   :  { %v2486_v13 = vmax.f32 %v2253_v43, 0.0  ;;  %v2485_v39 = vmax.f32 %v2255_v44, 0.0  ;;  %v2488_v47 = vmax.f32 %v2257_v40, 0.0  ;;  %v2487_v14 = vmax.f32 %v2259_v46, 0.0 }
 0x2d8   :  { %989 = vadd.xlane.f32.xlu0 %v988_v36  ;;  %v954_v15 = vadd.f32 %v945_v7, %v944_v60  ;;  %v991_v29 = vadd.f32 %v982_v10, %v981_v9  ;;  %v1010_v60 = vld [vmem:[%s2478_s4] sm:$0xff]  ;;  %v1726_v7 = vmov 2   ;;  %v2491_v24 = vmax.f32 %v2257_v40, 0.0 }
 0x2d9   :  { %v946_v30 = vadd.f32 %v2264_v59, %v2486_v13  ;;  %v947_v31 = vadd.f32 %v2275_v8, %v2485_v39  ;;  %v983_v42 = vadd.f32 %v2286_v11, %v2488_v47  ;;  %v984_v56 = vadd.f32 %v2291_v12, %v2487_v14  ;;  %1514 = vmatprep.mubr.msk.f32.mxu0 %vm494_vm0, %v1010_v60 }
 0x2da   :  { %1576 = vset.pattern.permute.xlu1 %v1726_v7  ;;  %1575 = vset.pattern.permute.xlu0 %v1726_v7 }
 0x2db   :  { %v957_v50 = vadd.f32 %v947_v31, %v946_v30  ;;  %v994_v36 = vadd.f32 %v984_v56, %v983_v42 }
 0x2dc   :  { %955 = vadd.xlane.f32.xlu0 %v954_v15 }
 0x2dd   :  { %958 = vadd.xlane.f32.xlu1 %v957_v50  ;;  %v930_v50 = vlaneseq }
 0x2df   :  { %v931_v9 = vand.u32 127, %v930_v50 }
 0x2e0   :  { %992 = vadd.xlane.f32.xlu0 %v991_v29 }
 0x2e1   :  { %995 = vadd.xlane.f32.xlu1 %v994_v36  ;;  %vm964_vm1 = vcmp.eq.s32.totalorder %v931_v9, 0  ;;  %vm1001_vm2 = vcmp.eq.s32.totalorder %v931_v9, 1 }
 0x2f2   :  { %1021 = vperm.xlu1 %1576, %v2096_v54  }
 0x2f6   :  { %1016 = vperm.xlu0 %1575, %v2090_v48   ;;  %1026 = vperm.xlu1 %1576, %v2102_v61  }
 0x2fa   :  { %1578 = vset.pattern.permute.xlu0 %v1723_v1  ;;  %1031 = vperm.xlu1 %1576, %v2107_v63  }
 0x35d   :  { %v950_v56 = vpop.xlane.xlu0 %949 }
 0x35e   :  { %v960_v29 = vmul.f32 0.00390625, %v950_v56 }
 0x360   :  { %v965_v60 = vsel %vm964_vm1, %v960_v29, 0.0 }
 0x361   :  { %v953_v10 = vpop.xlane.xlu1 %952  ;;  %v987_v15 = vpop.xlane.xlu0 %986 }
 0x362   :  { %v961_v30 = vmul.f32 0.00390625, %v953_v10  ;;  %v997_v31 = vmul.f32 0.00390625, %v987_v15 }
 0x364   :  { %v966_v7 = vsel %vm964_vm1, %v961_v30, 0.0  ;;  %v1002_v16 = vsel %vm1001_vm2, %v997_v31, %v965_v60 }
 0x365   :  { %v990_v42 = vpop.xlane.xlu0 %989 }
 0x366   :  { %v998_v36 = vmul.f32 0.00390625, %v990_v42 }
 0x368   :  { %v1003_v37 = vsel %vm1001_vm2, %v998_v36, %v966_v7 }
 0x369   :  { %v956_v39 = vpop.xlane.xlu0 %955  ;;  %v1534_v13 = vpack.c.bf16 %v1003_v37, %v1002_v16  ;;  %v1011_v37 = vld [vmem:[%s2478_s4 + $0x8] sm:$0xff]  ;;  %v1012_v16 = vld [vmem:[%s2478_s4 + $0x10] sm:$0xff] }
 0x36a   :  { %v959_v50 = vpop.xlane.xlu1 %958  ;;  %v962_v14 = vmul.f32 0.00390625, %v956_v39  ;;  %v1727_v39 = vmov 3  }
 0x36b   :  { %1535 = vmatprep.subr.bf16.mxu0 %v1534_v13  ;;  %v963_v56 = vmul.f32 0.00390625, %v959_v50  ;;  %1577 = vset.pattern.permute.xlu1 %v1727_v39 }
 0x36c   :  { %1537 = vmatpush3.bf16.msra.mxu0 %v1534_v13  ;;  %v967_v42 = vsel %vm964_vm1, %v962_v14, 0.0  ;;  %v1013_v13 = vld [vmem:[%s2478_s4 + $0x18] sm:$0xff]  ;;  %1136 = vperm.xlu1 %1577, %v2090_v48  }
 0x36d   :  { %v993_v10 = vpop.xlane.xlu0 %992  ;;  %v968_v29 = vsel %vm964_vm1, %v963_v56, 0.0 }
 0x36e   :  { %v999_v15 = vmul.f32 0.00390625, %v993_v10  ;;  %v996_v47 = vpop.xlane.xlu1 %995 }
 0x36f   :  { %v1000_v23 = vmul.f32 0.00390625, %v996_v47 }
 0x370   :  { %v1004_v30 = vsel %vm1001_vm2, %v999_v15, %v967_v42  ;;  %1140 = vperm.xlu1 %1577, %v2096_v54  }
 0x371   :  { %v1005_v31 = vsel %vm1001_vm2, %v1000_v23, %v968_v29  ;;  %v1131_v23 = vld [vmem:[%s2479_s5] sm:$0xff] }
 0x372   :  { %v1538_v36 = vpack.c.bf16 %v1005_v31, %v1004_v30  ;;  %1528 = vmatprep.mubr.msk.f32.mxu1 %vm494_vm0, %v1131_v23  ;;  %v1022_v47 = vpop.permute.xlu1 %1021  ;;  %v1134_v31 = vld [vmem:[%s2479_s5 + $0x18] sm:$0xff] }
 0x374   :  { %1539 = vmatprep.subr.bf16.mxu0 %v1538_v36  ;;  %1144 = vperm.xlu1 %1577, %v2102_v61   ;;  %v1132_v61 = vld [vmem:[%s2479_s5 + $0x8] sm:$0xff] }
 0x375   :  { %1541 = vmatpush3.bf16.msra.mxu0 %v1538_v36  ;;  %v1017_v9 = vpop.permute.xlu0 %1016 }
 0x376   :  { %v1027_v14 = vpop.permute.xlu1 %1026 }
 0x378   :  { %1515 = vmatmul.mubr.msk.f32.vlgmr.msra.gmra.mrb[8].mxu0 %vm494_vm0, %v1011_v37  ;;  %1148 = vperm.xlu1 %1577, %v2107_v63   ;;  %v1133_v63 = vld [vmem:[%s2479_s5 + $0x10] sm:$0xff] }
 0x379   :  { %1517 = vmatprep.mubr.msk.f32.mxu0 %vm494_vm0, %v1012_v16 }
 0x37a   :  { %v1032_v10 = vpop.permute.xlu1 %1031 }
 0x37c   :  { %1518 = vmatmul.mubr.msk.f32.gmra.mrb[10].mxu0 %vm494_vm0, %v1013_v13  ;;  %1579 = vset.pattern.permute.xlu1 %v1725_v5 }
 0x3eb   :  { %v1137_v36 = vpop.permute.xlu1 %1136 }
 0x3ef   :  { %v1141_v37 = vpop.permute.xlu1 %1140 }
 0x3f3   :  { %v1145_v16 = vpop.permute.xlu1 %1144 }
 0x44b   :  { %v1516_v60 = vpop.f32.mrb[8].mxu0 }
 0x44c   :  { %v1118_v7 = vadd.f32 %v1516_v60, %v1022_v47  ;;  %v1112_v50 = vpop.f32.mrb[9].mxu0 }
 0x44d   :  { %v1113_v56 = vadd.f32 %v1112_v50, %v1017_v9 }
 0x44f   :  { %v1542_v15 = vpack.c.bf16 %v1118_v7, %v1113_v56  ;;  %v1519_v42 = vpop.f32.mrb[10].mxu0  ;;  %v1149_v7 = vpop.permute.xlu1 %1148 }
 0x450   :  { %v1128_v29 = vadd.f32 %v1519_v42, %v1032_v10  ;;  %v1122_v48 = vpop.f32.mrb[11].mxu0 }
 0x451   :  { %v1123_v30 = vadd.f32 %v1122_v48, %v1027_v14  ;;  %1543 = vmatprep.subr.bf16.mxu1 %v1542_v15 }
 0x452   :  { %1545 = vmatpush3.bf16.msra.mxu1 %v1542_v15 }
 0x453   :  { %v1546_v54 = vpack.c.bf16 %v1128_v29, %v1123_v30 }
 0x455   :  { %1547 = vmatprep.subr.bf16.mxu1 %v1546_v54 }
 0x456   :  { %1549 = vmatpush3.bf16.msra.mxu1 %v1546_v54 }
 0x459   :  { %1529 = vmatmul.mubr.msk.f32.vlgmr.msra.gmra.mrb[8].mxu1 %vm494_vm0, %v1132_v61 }
 0x45a   :  { %1531 = vmatprep.mubr.msk.f32.mxu1 %vm494_vm0, %v1133_v63 }
 0x45d   :  { %1532 = vmatmul.mubr.msk.f32.gmra.mrb[10].mxu1 %vm494_vm0, %v1134_v31 }
 0x52c   :  { %v1530_v13 = vpop.f32.mrb[8].mxu1 }
 0x52d   :  { %v1235_v23 = vadd.f32 %v1530_v13, %v1141_v37  ;;  %v1229_v39 = vpop.f32.mrb[9].mxu1 }
 0x52e   :  { %v1230_v47 = vadd.f32 %v1229_v39, %v1137_v36 }
 0x52f   :  { %v1249_v14 = vsub.f32 0.0, %v1235_v23 }
 0x530   :  { %v1248_v9 = vsub.f32 0.0, %v1230_v47  ;;  %v1533_v60 = vpop.f32.mrb[10].mxu1 }
 0x531   :  { %v1254_v50 = vmul.f32 1.442695, %v1249_v14  ;;  %v1245_v56 = vadd.f32 %v1533_v60, %v1149_v7  ;;  %v1239_v10 = vpop.f32.mrb[11].mxu1  ;;  %v1350_v60 = vsub.f32 %v904_v4, %v2192_v62  ;;  %v1282_v7 = vsub.f32 %v902_v2, %v2170_v57 }
 0x532   :  { %v1252_v15 = vmul.f32 1.442695, %v1248_v9  ;;  %v1240_v42 = vadd.f32 %v1239_v10, %v1145_v16  ;;  %v1280_v2 = vsub.f32 %v898_v38, %v2136_v17 }
 0x533   :  { %1707 = vpow2.f32 %v1254_v50  ;;  %v1251_v29 = vsub.f32 0.0, %v1245_v56  ;;  %v1283_v50 = vsub.f32 %v903_v3, %v2181_v58 }
 0x534   :  { %1709 = vpow2.f32 %v1252_v15  ;;  %v1250_v48 = vsub.f32 0.0, %v1240_v42 }
 0x535   :  { %v1258_v30 = vmul.f32 1.442695, %v1251_v29 }
 0x536   :  { %v1256_v54 = vmul.f32 1.442695, %v1250_v48  ;;  %v2493_v48 = vmax.f32 %v2253_v43, 0.0  ;;  %v2495_v43 = vmax.f32 %v2219_v18, 0.0 }
 0x537   :  { %1711 = vpow2.f32 %v1258_v30 }
 0x538   :  { %1713 = vpow2.f32 %v1256_v54  ;;  %v1286_v30 = vsub.f32 %v2493_v48, %v2264_v59  ;;  %v2494_v54 = vmax.f32 %v2255_v44, 0.0  ;;  %v1284_v44 = vsub.f32 %v2495_v43, %v2232_v51 }
 0x53d   :  { %v1708_v61 = vpop.eup %1707 }
 0x53e   :  { %v1710_v63 = vpop.eup %1709  ;;  %v1261_v31 = vadd.f32 1.0, %v1708_v61  ;;  %v1287_v61 = vsub.f32 %v2494_v54, %v2275_v8 }
 0x53f   :  { %v1260_v36 = vadd.f32 1.0, %v1710_v63 }
 0x540   :  { %1715 = vrcp.f32 %v1261_v31 }
 0x541   :  { %v1712_v37 = vpop.eup %1711  ;;  %1717 = vrcp.f32 %v1260_v36 }
 0x542   :  { %v1263_v13 = vadd.f32 1.0, %v1712_v37  ;;  %v1714_v23 = vpop.eup %1713 }
 0x543   :  { %v1262_v39 = vadd.f32 1.0, %v1714_v23 }
 0x544   :  { %1719 = vrcp.f32 %v1263_v13 }
 0x545   :  { %1721 = vrcp.f32 %v1262_v39 }
 0x54a   :  { %v1716_v16 = vpop.eup %1715 }
 0x54b   :  { %1361 = vperm.xlu1 %1579, %v1716_v16   ;;  %1295 = vperm.xlu0 %1578, %v1716_v16   ;;  %v1718_v47 = vpop.eup %1717 }
 0x54e   :  { %v1720_v14 = vpop.eup %1719 }
 0x54f   :  { %1580 = vset.pattern.permute.xlu1 %v1723_v1  ;;  %1581 = vset.pattern.permute.xlu0 %v1725_v5  ;;  %v1722_v9 = vpop.eup %1721  ;;  %v1351_v1 = vsub.f32 %v905_v6, %v2197_v0 }
 0x550   :  { %1357 = vperm.xlu0 %1581, %v1718_v47   ;;  %1290 = vperm.xlu1 %1580, %v1718_v47  }
 0x554   :  { %1369 = vperm.xlu0 %1581, %v1720_v14   ;;  %1305 = vperm.xlu1 %1580, %v1720_v14  }
 0x558   :  { %1300 = vperm.xlu1 %1580, %v1722_v9  }
 0x55c   :  { %1582 = vset.pattern.permute.xlu1 %v1725_v5 }
 0x55d   :  { %1365 = vperm.xlu1 %1582, %v1722_v9  }
 0x5ca   :  { %v1362_v56 = vpop.permute.xlu1 %1361  ;;  %v1296_v10 = vpop.permute.xlu0 %1295 }
 0x5cb   :  { %v1374_v5 = vmul.f32 %v1362_v56, %v1350_v60  ;;  %v1375_v15 = vmul.f32 %v1362_v56, %v1351_v1  ;;  %v1310_v42 = vmul.f32 %v1296_v10, %v1282_v7  ;;  %v1311_v29 = vmul.f32 %v1296_v10, %v1283_v50 }
 0x5cc   :  { %v2498_v60 = vmax.f32 %v2225_v26, 0.0 }
 0x5cd   :  { %v1382_v52 = vadd.f32 %v1374_v5, %v2192_v62  ;;  %v1383_v4 = vadd.f32 %v1375_v15, %v2197_v0  ;;  %v1318_v53 = vadd.f32 %v1310_v42, %v2170_v57  ;;  %v1319_v6 = vadd.f32 %v1311_v29, %v2181_v58 }
 0x5ce   :  { %v2490_v62 = vmax.f32 %v2123_v33, 0.0  ;;  %v1354_v57 = vsub.f32 %v2491_v24, %v2286_v11  ;;  %v2492_v58 = vmax.f32 %v2259_v46, 0.0  ;;  %v2496_v46 = vmax.f32 %v2221_v21, 0.0 }
 0x5cf   :  { %1390 = vst [vmem:[%s2480_s6 + $0x30] sm:$0xff] %v1382_v52  ;;  %1391 = vst [vmem:[%s2480_s6 + $0x38] sm:$0xff] %v1383_v4  ;;  %v1358_v32 = vpop.permute.xlu0 %1357  ;;  %v1291_v34 = vpop.permute.xlu1 %1290  ;;  %v1353_v1 = vsub.f32 %v2498_v60, %v2251_v19 }
 0x5d0   :  { %v1281_v0 = vsub.f32 %v2490_v62, %v2141_v20  ;;  %1326 = vst [vmem:[%s2480_s6 + $0x20] sm:$0xff] %v1318_v53  ;;  %1327 = vst [vmem:[%s2480_s6 + $0x28] sm:$0xff] %v1319_v6  ;;  %v1372_v33 = vmul.f32 %v1358_v32, %v1348_v45  ;;  %v1373_v35 = vmul.f32 %v1358_v32, %v1349_v49 }
 0x5d1   :  { %v1308_v38 = vmul.f32 %v1291_v34, %v1280_v2  ;;  %v1355_v3 = vsub.f32 %v2492_v58, %v2291_v12  ;;  %v1285_v23 = vsub.f32 %v2496_v46, %v2237_v55 }
 0x5d2   :  { %v1309_v27 = vmul.f32 %v1291_v34, %v1281_v0  ;;  %v1380_v63 = vadd.f32 %v1372_v33, %v2150_v28  ;;  %v1381_v31 = vadd.f32 %v1373_v35, %v2155_v41 }
 0x5d3   :  { %v1316_v36 = vadd.f32 %v1308_v38, %v2136_v17  ;;  %v1370_v37 = vpop.permute.xlu0 %1369  ;;  %v1306_v13 = vpop.permute.xlu1 %1305 }
 0x5d4   :  { %v1317_v40 = vadd.f32 %v1309_v27, %v2141_v20  ;;  %1388 = vst [vmem:[%s2480_s6 + $0x10] sm:$0xff] %v1380_v63  ;;  %1389 = vst [vmem:[%s2480_s6 + $0x18] sm:$0xff] %v1381_v31  ;;  %v1378_v17 = vmul.f32 %v1370_v37, %v1354_v57  ;;  %v1379_v20 = vmul.f32 %v1370_v37, %v1355_v3 }
 0x5d5   :  { %1324 = vst [vmem:[%s2480_s6] sm:$0xff] %v1316_v36  ;;  %v1314_v28 = vmul.f32 %v1306_v13, %v1286_v30  ;;  %v1315_v41 = vmul.f32 %v1306_v13, %v1287_v61 }
 0x5d6   :  { %1325 = vst [vmem:[%s2480_s6 + $0x8] sm:$0xff] %v1317_v40  ;;  %v1386_v39 = vadd.f32 %v1378_v17, %v2286_v11  ;;  %v1387_v16 = vadd.f32 %v1379_v20, %v2291_v12  ;;  %v2497_v11 = vmax.f32 %v2223_v25, 0.0 }
 0x5d7   :  { %v1322_v47 = vadd.f32 %v1314_v28, %v2264_v59  ;;  %v1323_v14 = vadd.f32 %v1315_v41, %v2275_v8  ;;  %v1301_v9 = vpop.permute.xlu1 %1300 }
 0x5d8   :  { %1394 = vst [vmem:[%s2480_s6 + $0x70] sm:$0xff] %v1386_v39  ;;  %1395 = vst [vmem:[%s2480_s6 + $0x78] sm:$0xff] %v1387_v16  ;;  %v1312_v18 = vmul.f32 %v1301_v9, %v1284_v44  ;;  %v1313_v21 = vmul.f32 %v1301_v9, %v1285_v23  ;;  %v1352_v12 = vsub.f32 %v2497_v11, %v2246_v22 }
 0x5d9   :  { %1330 = vst [vmem:[%s2480_s6 + $0x60] sm:$0xff] %v1322_v47  ;;  %1331 = vst [vmem:[%s2480_s6 + $0x68] sm:$0xff] %v1323_v14 }
 0x5da   :  { %v1320_v59 = vadd.f32 %v1312_v18, %v2232_v51  ;;  %v1321_v8 = vadd.f32 %v1313_v21, %v2237_v55 }
 0x5dc   :  { %1328 = vst [vmem:[%s2480_s6 + $0x40] sm:$0xff] %v1320_v59  ;;  %1329 = vst [vmem:[%s2480_s6 + $0x48] sm:$0xff] %v1321_v8  ;;  %v1366_v7 = vpop.permute.xlu1 %1365 }
 0x5dd   :  { %v1376_v51 = vmul.f32 %v1366_v7, %v1352_v12  ;;  %v1377_v50 = vmul.f32 %v1366_v7, %v1353_v1 }
 0x5df   :  { %v1384_v55 = vadd.f32 %v1376_v51, %v2246_v22  ;;  %v1385_v25 = vadd.f32 %v1377_v50, %v2251_v19 }
 0x5e1   :  { %1392 = vst [vmem:[%s2480_s6 + $0x50] sm:$0xff] %v1384_v55  ;;  %1393 = vst [vmem:[%s2480_s6 + $0x58] sm:$0xff] %v1385_v25 }

</bundles_post_ra>
